<compile_context>
chip_gen: v6e
topology: v6e:2x2x1
jax: 0.10.0
libtpu: 0.0.40
codegen_flags: <defaults>
</compile_context>

<pallas_src>
import functools
import math

import jax
import jax.numpy as jnp
from jax.experimental import pallas as pl
from jax.experimental.pallas import tpu as pltpu


def _na1d_kernel(x_ref, wq_ref, bq_ref, wk_ref, bk_ref, wv_ref, bv_ref,
                 wp_ref, bp_ref, bias_ref, o_ref, acc_ref,
                 *, batch_tile, seq_len, q_tile, win, ksize):
    """One (batch-block, head) grid step.

    x_ref    : (BT*L, C)      input rows (resident in VMEM across the head axis)
    wq/wk/wv : (1, C, hd)     per-head projection weights (q scale folded into wq)
    bq/bk/bv : (1, 1, hd)     per-head projection biases
    wp_ref   : (1, hd, C)     per-head rows of the output projection
    bp_ref   : (1, C)         output projection bias (fetched once)
    bias_ref : (L, W)         additive neighborhood mask, banded layout (fetched once)
    o_ref    : (BT*L, C)      output rows (written on the last head)
    acc_ref  : (BT*L, C) f32  accumulator over heads
    """
    h = pl.program_id(1)

    x = x_ref[...]                                                        # (RT, C)
    q = jnp.dot(x, wq_ref[0], preferred_element_type=jnp.float32) + bq_ref[0]
    k = jnp.dot(x, wk_ref[0], preferred_element_type=jnp.float32) + bk_ref[0]
    v = jnp.dot(x, wv_ref[0], preferred_element_type=jnp.float32) + bv_ref[0]
    hd = q.shape[-1]

    q3 = q.reshape(batch_tile, seq_len, hd)
    k3 = k.reshape(batch_tile, seq_len, hd)
    v3 = v.reshape(batch_tile, seq_len, hd)

    n_tiles = seq_len // q_tile
    out_tiles = []
    for t in range(n_tiles):                       # static unroll over banded query tiles
        q0 = t * q_tile
        # static band start (same formula used by the wrapper to build bias_ref)
        w0 = min(max(q0 - ksize // 2, 0), seq_len - win)
        qt = q3[:, q0:q0 + q_tile, :]              # (BT, TQ, hd)
        kt = k3[:, w0:w0 + win, :]                 # (BT, W,  hd)
        vt = v3[:, w0:w0 + win, :]
        bias_t = bias_ref[q0:q0 + q_tile, :]       # (TQ, W) additive mask (0 / -1e30)

        s = jnp.einsum('bqd,bkd->bqk', qt, kt,
                       preferred_element_type=jnp.float32) + bias_t       # (BT, TQ, W)
        m = jnp.max(s, axis=-1, keepdims=True)
        p = jnp.exp(s - m)
        p = p * pl.reciprocal(jnp.sum(p, axis=-1, keepdims=True), approx=True)
        out_tiles.append(jnp.einsum('bqk,bkd->bqd', p, vt,
                                    preferred_element_type=jnp.float32))  # (BT, TQ, hd)

    o_h = out_tiles[0] if n_tiles == 1 else jnp.concatenate(out_tiles, axis=1)

    # this head's contribution to the output projection: (RT, hd) @ (hd, C)
    contrib = jnp.dot(o_h.reshape(batch_tile * seq_len, hd), wp_ref[0],
                      preferred_element_type=jnp.float32)                 # (RT, C)

    @pl.when(h == 0)
    def _():
        acc_ref[...] = contrib + bp_ref[...]

    @pl.when(h != 0)
    def _():
        acc_ref[...] = acc_ref[...] + contrib

    @pl.when(h == pl.num_programs(1) - 1)
    def _():
        o_ref[...] = acc_ref[...].astype(o_ref.dtype)


def neighborhood_attention_1d(x, wqkv, bqkv, wproj, bproj, *,
                              num_heads, kernel_size,
                              batch_tile=None, q_tile=None):
    """x: (B, L, C); wqkv: (C, 3C); bqkv: (1, 3C); wproj: (C, C); bproj: (1, C)."""
    B, L, C = x.shape
    H = num_heads
    assert C % H == 0
    hd = C // H

    K = int(min(kernel_size, L))          # clamp: L < kernel_size would be ill-defined
    scale = hd ** (-0.5)

    # ---- host-side parameter preparation (trace time, free) --------------------------
    wq = wqkv[:, 0 * C:1 * C] * scale     # fold q-scale into weights + bias
    wk = wqkv[:, 1 * C:2 * C]
    wv = wqkv[:, 2 * C:3 * C]
    bq = bqkv[:, 0 * C:1 * C] * scale
    bk = bqkv[:, 1 * C:2 * C]
    bv = bqkv[:, 2 * C:3 * C]

    # per-head layouts so the kernel never lane-slices by head_dim
    wq_h = wq.reshape(C, H, hd).transpose(1, 0, 2)   # (H, C, hd)
    wk_h = wk.reshape(C, H, hd).transpose(1, 0, 2)
    wv_h = wv.reshape(C, H, hd).transpose(1, 0, 2)
    bq_h = bq.reshape(1, H, hd).transpose(1, 0, 2)   # (H, 1, hd)
    bk_h = bk.reshape(1, H, hd).transpose(1, 0, 2)
    bv_h = bv.reshape(1, H, hd).transpose(1, 0, 2)
    wp_h = wproj.reshape(H, hd, C)                   # per-head rows of W_proj

    # ---- tiling -----------------------------------------------------------------------
    if batch_tile is None:
        batch_tile = max(1, 256 // L)                # aim for >=256 rows per grid step...
        if B >= 2:
            batch_tile = min(batch_tile, B // 2)     # ...but keep >=2 parallel row blocks
        batch_tile = max(1, min(batch_tile, B))
    while B % batch_tile:
        batch_tile -= 1
    n_row_blocks = B // batch_tile
    rt = batch_tile * L

    if q_tile is None:
        q_tile = L if L <= 128 else 128
    if L % q_tile:
        q_tile = L
    win = min(q_tile + K - 1, L)                     # key-band width per query tile

    # ---- precomputed additive neighborhood mask, banded layout (L, W) -----------------
    ii = jnp.arange(L)
    start = jnp.clip(ii - K // 2, 0, L - K)                          # per-query window start
    w0 = jnp.clip((ii // q_tile) * q_tile - K // 2, 0, L - win)      # per-query band start
    jj = w0[:, None] + jnp.arange(win)[None, :]                      # global key index
    valid = (jj >= start[:, None]) & (jj < start[:, None] + K)
    bias = jnp.where(valid, 0.0, -1e30).astype(jnp.float32)          # (L, W)

    x2 = x.reshape(B * L, C)

    kern = functools.partial(_na1d_kernel, batch_tile=batch_tile, seq_len=L,
                             q_tile=q_tile, win=win, ksize=K)

    out_flat = pl.pallas_call(
        kern,
        out_shape=jax.ShapeDtypeStruct((B * L, C), x.dtype),
        grid_spec=pltpu.PrefetchScalarGridSpec(
            num_scalar_prefetch=0,
            grid=(n_row_blocks, H),                  # head axis = reduction (last)
            in_specs=[
                pl.BlockSpec((rt, C), lambda r, h: (r, 0)),        # x rows (resident over h)
                pl.BlockSpec((1, C, hd), lambda r, h: (h, 0, 0)),  # wq (per head)
                pl.BlockSpec((1, 1, hd), lambda r, h: (h, 0, 0)),  # bq
                pl.BlockSpec((1, C, hd), lambda r, h: (h, 0, 0)),  # wk
                pl.BlockSpec((1, 1, hd), lambda r, h: (h, 0, 0)),  # bk
                pl.BlockSpec((1, C, hd), lambda r, h: (h, 0, 0)),  # wv
                pl.BlockSpec((1, 1, hd), lambda r, h: (h, 0, 0)),  # bv
                pl.BlockSpec((1, hd, C), lambda r, h: (h, 0, 0)),  # wproj rows (per head)
                pl.BlockSpec((1, C), lambda r, h: (0, 0)),         # bproj (fetched once)
                pl.BlockSpec((L, win), lambda r, h: (0, 0)),       # mask bias (fetched once)
            ],
            out_specs=pl.BlockSpec((rt, C), lambda r, h: (r, 0)),  # resident over head axis
            scratch_shapes=[pltpu.VMEM((rt, C), jnp.float32)],
        ),
        compiler_params=pltpu.CompilerParams(
            dimension_semantics=("parallel", "arbitrary"),
            vmem_limit_bytes=48 * 1024 * 1024,
        ),
    )(x2, wq_h, bq_h, wk_h, bk_h, wv_h, bv_h, wp_h, bproj, bias)

    return out_flat.reshape(B, L, C)


def _reference(x, wqkv, bqkv, wproj, bproj, *, num_heads, kernel_size):
    """Pure-JAX gather-based reference mimicking na1d_qk / softmax / na1d_av."""
    B, L, C = x.shape
    hd = C // num_heads
    scale = hd ** (-0.5)
    K = kernel_size

    qkv = x @ wqkv + bqkv[0]
    qkv = qkv.reshape(B, L, 3, num_heads, hd).transpose(2, 0, 3, 1, 4)  # (3,B,H,L,hd)
    q, k, v = qkv[0] * scale, qkv[1], qkv[2]

    idx = jnp.arange(L)
    start = jnp.clip(idx - K // 2, 0, L - K)                 # (L,)
    nbr = start[:, None] + jnp.arange(K)[None, :]            # (L, K)
    k_g = k[:, :, nbr, :]                                    # (B,H,L,K,hd)
    v_g = v[:, :, nbr, :]

    attn = jnp.einsum('bhld,bhlkd->bhlk', q, k_g)
    attn = jax.nn.softmax(attn, axis=-1)
    out = jnp.einsum('bhlk,bhlkd->bhld', attn, v_g)
    out = out.transpose(0, 2, 1, 3).reshape(B, L, C)
    return out @ wproj + bproj[0]


if __name__ == "__main__":
    # Small shapes consistent with the module's forward.
    B, L, C = 2, 16, 32          # batch, sequence length, dim
    num_heads = 4                # head_dim = 8
    k_neighbors = 16             # kernel_size = int(sqrt(16)) + 1 = 5
    kernel_size = int(math.sqrt(k_neighbors)) + 1

    key = jax.random.PRNGKey(0)
    kx, k1, k2, k3, k4 = jax.random.split(key, 5)

    x = jax.random.normal(kx, (B, L, C), dtype=jnp.float32)

    # Deterministic parameters (PyTorch-shape weights, transposed to (in, out)).
    wqkv_pt = 0.02 * jax.random.normal(k1, (3 * C, C), dtype=jnp.float32)   # (out, in)
    bqkv = 0.02 * jax.random.normal(k2, (1, 3 * C), dtype=jnp.float32)
    wproj_pt = 0.02 * jax.random.normal(k3, (C, C), dtype=jnp.float32)
    bproj = 0.02 * jax.random.normal(k4, (1, C), dtype=jnp.float32)
    wqkv = wqkv_pt.T       # (C, 3C)
    wproj = wproj_pt.T     # (C, C)

    # batch_tile=1 -> 2 parallel row blocks (v7x 2-TC); q_tile=8 -> exercises the
    # banded path (2 query tiles, 12-wide key band) at these tiny shapes.
    out = neighborhood_attention_1d(
        x, wqkv, bqkv, wproj, bproj,
        num_heads=num_heads, kernel_size=kernel_size,
        batch_tile=1, q_tile=8)
    out = jax.block_until_ready(out)

    ref = _reference(x, wqkv, bqkv, wproj, bproj,
                     num_heads=num_heads, kernel_size=kernel_size)
    assert out.shape == (B, L, C)
    err = float(jnp.max(jnp.abs(out - ref)))
    # tolerance covers the EUP approximate-reciprocal softmax normalisation
    assert err < 2e-3, f"mismatch vs. reference: max abs err {err}"

    print("KERNEL_OK")
</pallas_src>

<mosaic_0001>
module attributes {stable_mosaic.version = 11 : i64} {
  func.func @_na1d_kernel(%arg0: i32, %arg1: i32, %arg2: memref<16x32xf32, #tpu.memory_space<vmem>>, %arg3: memref<1x32x8xf32, #tpu.memory_space<vmem>>, %arg4: memref<1x1x8xf32, #tpu.memory_space<vmem>>, %arg5: memref<1x32x8xf32, #tpu.memory_space<vmem>>, %arg6: memref<1x1x8xf32, #tpu.memory_space<vmem>>, %arg7: memref<1x32x8xf32, #tpu.memory_space<vmem>>, %arg8: memref<1x1x8xf32, #tpu.memory_space<vmem>>, %arg9: memref<1x8x32xf32, #tpu.memory_space<vmem>>, %arg10: memref<1x32xf32, #tpu.memory_space<vmem>>, %arg11: memref<16x12xf32, #tpu.memory_space<vmem>>, %arg12: memref<16x32xf32, #tpu.memory_space<vmem>>, %arg13: memref<16x32xf32, #tpu.memory_space<vmem>>) attributes {dimension_semantics = [#tpu.dimension_semantics<parallel>, #tpu.dimension_semantics<arbitrary>], iteration_bounds = array<i64: 2, 4>, scalar_prefetch = 0 : i64, scratch_operands = 1 : i64, tpu.core_type = #tpu.core_type<tc>, window_params = [{transform_indices = @transform_0, window_bounds = array<i64: 16, 32>}, {transform_indices = @transform_1, window_bounds = array<i64: 1, 32, 8>}, {transform_indices = @transform_2, window_bounds = array<i64: 1, 1, 8>}, {transform_indices = @transform_3, window_bounds = array<i64: 1, 32, 8>}, {transform_indices = @transform_4, window_bounds = array<i64: 1, 1, 8>}, {transform_indices = @transform_5, window_bounds = array<i64: 1, 32, 8>}, {transform_indices = @transform_6, window_bounds = array<i64: 1, 1, 8>}, {transform_indices = @transform_7, window_bounds = array<i64: 1, 8, 32>}, {pipeline_mode = #tpu.pipeline_mode<synchronous>, transform_indices = @transform_8, window_bounds = array<i64: 1, 32>}, {pipeline_mode = #tpu.pipeline_mode<synchronous>, transform_indices = @transform_9, window_bounds = array<i64: 16, 12>}, {transform_indices = @transform_10, window_bounds = array<i64: 16, 32>}]} {
    %c0 = arith.constant 0 : index
    %c0_0 = arith.constant 0 : index
    %0 = vector.load %arg2[%c0, %c0_0] : memref<16x32xf32, #tpu.memory_space<vmem>>, vector<16x32xf32>
    %c0_1 = arith.constant 0 : index
    %c0_2 = arith.constant 0 : index
    %c0_3 = arith.constant 0 : index
    %1 = vector.load %arg3[%c0_1, %c0_2, %c0_3] : memref<1x32x8xf32, #tpu.memory_space<vmem>>, vector<1x32x8xf32>
    %2 = vector.shape_cast %1 : vector<1x32x8xf32> to vector<32x8xf32>
    %cst = arith.constant dense<0.000000e+00> : vector<16x8xf32>
    %3 = tpu.matmul %0, %2, %cst {dimension_numbers = #tpu.dot_dimension_numbers<[1], [0], [0], [1], [0, 0, 1, 1], [], []>} : vector<16x32xf32>, vector<32x8xf32>, vector<16x8xf32> -> vector<16x8xf32>
    %c0_4 = arith.constant 0 : index
    %c0_5 = arith.constant 0 : index
    %c0_6 = arith.constant 0 : index
    %4 = vector.load %arg4[%c0_4, %c0_5, %c0_6] : memref<1x1x8xf32, #tpu.memory_space<vmem>>, vector<1x1x8xf32>
    %5 = vector.shape_cast %4 : vector<1x1x8xf32> to vector<1x8xf32>
    %6 = vector.broadcast %5 : vector<1x8xf32> to vector<16x8xf32>
    %7 = arith.addf %3, %6 : vector<16x8xf32>
    %c0_7 = arith.constant 0 : index
    %c0_8 = arith.constant 0 : index
    %c0_9 = arith.constant 0 : index
    %8 = vector.load %arg5[%c0_7, %c0_8, %c0_9] : memref<1x32x8xf32, #tpu.memory_space<vmem>>, vector<1x32x8xf32>
    %9 = vector.shape_cast %8 : vector<1x32x8xf32> to vector<32x8xf32>
    %cst_10 = arith.constant dense<0.000000e+00> : vector<16x8xf32>
    %10 = tpu.matmul %0, %9, %cst_10 {dimension_numbers = #tpu.dot_dimension_numbers<[1], [0], [0], [1], [0, 0, 1, 1], [], []>} : vector<16x32xf32>, vector<32x8xf32>, vector<16x8xf32> -> vector<16x8xf32>
    %c0_11 = arith.constant 0 : index
    %c0_12 = arith.constant 0 : index
    %c0_13 = arith.constant 0 : index
    %11 = vector.load %arg6[%c0_11, %c0_12, %c0_13] : memref<1x1x8xf32, #tpu.memory_space<vmem>>, vector<1x1x8xf32>
    %12 = vector.shape_cast %11 : vector<1x1x8xf32> to vector<1x8xf32>
    %13 = vector.broadcast %12 : vector<1x8xf32> to vector<16x8xf32>
    %14 = arith.addf %10, %13 : vector<16x8xf32>
    %c0_14 = arith.constant 0 : index
    %c0_15 = arith.constant 0 : index
    %c0_16 = arith.constant 0 : index
    %15 = vector.load %arg7[%c0_14, %c0_15, %c0_16] : memref<1x32x8xf32, #tpu.memory_space<vmem>>, vector<1x32x8xf32>
    %16 = vector.shape_cast %15 : vector<1x32x8xf32> to vector<32x8xf32>
    %cst_17 = arith.constant dense<0.000000e+00> : vector<16x8xf32>
    %17 = tpu.matmul %0, %16, %cst_17 {dimension_numbers = #tpu.dot_dimension_numbers<[1], [0], [0], [1], [0, 0, 1, 1], [], []>} : vector<16x32xf32>, vector<32x8xf32>, vector<16x8xf32> -> vector<16x8xf32>
    %c0_18 = arith.constant 0 : index
    %c0_19 = arith.constant 0 : index
    %c0_20 = arith.constant 0 : index
    %18 = vector.load %arg8[%c0_18, %c0_19, %c0_20] : memref<1x1x8xf32, #tpu.memory_space<vmem>>, vector<1x1x8xf32>
    %19 = vector.shape_cast %18 : vector<1x1x8xf32> to vector<1x8xf32>
    %20 = vector.broadcast %19 : vector<1x8xf32> to vector<16x8xf32>
    %21 = arith.addf %17, %20 : vector<16x8xf32>
    %22 = vector.shape_cast %7 : vector<16x8xf32> to vector<1x16x8xf32>
    %23 = vector.shape_cast %14 : vector<16x8xf32> to vector<1x16x8xf32>
    %24 = vector.shape_cast %21 : vector<16x8xf32> to vector<1x16x8xf32>
    %25 = vector.extract_strided_slice %22 {offsets = [0, 0, 0], sizes = [1, 8, 8], strides = [1, 1, 1]} : vector<1x16x8xf32> to vector<1x8x8xf32>
    %26 = vector.extract_strided_slice %23 {offsets = [0, 0, 0], sizes = [1, 12, 8], strides = [1, 1, 1]} : vector<1x16x8xf32> to vector<1x12x8xf32>
    %27 = vector.extract_strided_slice %24 {offsets = [0, 0, 0], sizes = [1, 12, 8], strides = [1, 1, 1]} : vector<1x16x8xf32> to vector<1x12x8xf32>
    %c0_21 = arith.constant 0 : index
    %c0_22 = arith.constant 0 : index
    %28 = vector.load %arg11[%c0_21, %c0_22] : memref<16x12xf32, #tpu.memory_space<vmem>>, vector<8x12xf32>
    "tpu.trace_start"() <{level = 10 : i32, message = "bqd,bkd->bqk"}> : () -> ()
    %cst_23 = arith.constant dense<0.000000e+00> : vector<1x8x12xf32>
    %29 = tpu.matmul %25, %26, %cst_23 {dimension_numbers = #tpu.dot_dimension_numbers<[2], [2], [1], [1], [0, 0, 0, 1, 1, 1], [0], [0]>} : vector<1x8x8xf32>, vector<1x12x8xf32>, vector<1x8x12xf32> -> vector<1x8x12xf32>
    "tpu.trace_stop"() : () -> ()
    %30 = vector.shape_cast %28 : vector<8x12xf32> to vector<1x8x12xf32>
    %31 = arith.addf %29, %30 : vector<1x8x12xf32>
    %cst_24 = arith.constant dense<0xFF800000> : vector<1x8xf32>
    %32 = vector.multi_reduction <maximumf>, %31, %cst_24 [2] : vector<1x8x12xf32> to vector<1x8xf32>
    %33 = vector.shape_cast %32 : vector<1x8xf32> to vector<1x8x1xf32>
    %34 = vector.broadcast %33 : vector<1x8x1xf32> to vector<1x8x12xf32>
    %35 = arith.subf %31, %34 : vector<1x8x12xf32>
    %36 = math.exp %35 : vector<1x8x12xf32>
    %cst_25 = arith.constant dense<0.000000e+00> : vector<1x8xf32>
    %37 = vector.multi_reduction <add>, %36, %cst_25 [2] : vector<1x8x12xf32> to vector<1x8xf32>
    %38 = vector.shape_cast %37 : vector<1x8xf32> to vector<1x8x1xf32>
    %39 = tpu.reciprocal %38 {approx = true} : vector<1x8x1xf32> -> vector<1x8x1xf32>
    %40 = vector.broadcast %39 : vector<1x8x1xf32> to vector<1x8x12xf32>
    %41 = arith.mulf %36, %40 : vector<1x8x12xf32>
    "tpu.trace_start"() <{level = 10 : i32, message = "bqk,bkd->bqd"}> : () -> ()
    %cst_26 = arith.constant dense<0.000000e+00> : vector<1x8x8xf32>
    %42 = tpu.matmul %41, %27, %cst_26 {dimension_numbers = #tpu.dot_dimension_numbers<[2], [1], [1], [2], [0, 0, 0, 1, 1, 2], [0], [0]>} : vector<1x8x12xf32>, vector<1x12x8xf32>, vector<1x8x8xf32> -> vector<1x8x8xf32>
    "tpu.trace_stop"() : () -> ()
    %43 = vector.extract_strided_slice %22 {offsets = [0, 8, 0], sizes = [1, 8, 8], strides = [1, 1, 1]} : vector<1x16x8xf32> to vector<1x8x8xf32>
    %44 = vector.extract_strided_slice %23 {offsets = [0, 4, 0], sizes = [1, 12, 8], strides = [1, 1, 1]} : vector<1x16x8xf32> to vector<1x12x8xf32>
    %45 = vector.extract_strided_slice %24 {offsets = [0, 4, 0], sizes = [1, 12, 8], strides = [1, 1, 1]} : vector<1x16x8xf32> to vector<1x12x8xf32>
    %c8 = arith.constant 8 : index
    %c0_27 = arith.constant 0 : index
    %46 = vector.load %arg11[%c8, %c0_27] : memref<16x12xf32, #tpu.memory_space<vmem>>, vector<8x12xf32>
    "tpu.trace_start"() <{level = 10 : i32, message = "bqd,bkd->bqk"}> : () -> ()
    %cst_28 = arith.constant dense<0.000000e+00> : vector<1x8x12xf32>
    %47 = tpu.matmul %43, %44, %cst_28 {dimension_numbers = #tpu.dot_dimension_numbers<[2], [2], [1], [1], [0, 0, 0, 1, 1, 1], [0], [0]>} : vector<1x8x8xf32>, vector<1x12x8xf32>, vector<1x8x12xf32> -> vector<1x8x12xf32>
    "tpu.trace_stop"() : () -> ()
    %48 = vector.shape_cast %46 : vector<8x12xf32> to vector<1x8x12xf32>
    %49 = arith.addf %47, %48 : vector<1x8x12xf32>
    %cst_29 = arith.constant dense<0xFF800000> : vector<1x8xf32>
    %50 = vector.multi_reduction <maximumf>, %49, %cst_29 [2] : vector<1x8x12xf32> to vector<1x8xf32>
    %51 = vector.shape_cast %50 : vector<1x8xf32> to vector<1x8x1xf32>
    %52 = vector.broadcast %51 : vector<1x8x1xf32> to vector<1x8x12xf32>
    %53 = arith.subf %49, %52 : vector<1x8x12xf32>
    %54 = math.exp %53 : vector<1x8x12xf32>
    %cst_30 = arith.constant dense<0.000000e+00> : vector<1x8xf32>
    %55 = vector.multi_reduction <add>, %54, %cst_30 [2] : vector<1x8x12xf32> to vector<1x8xf32>
    %56 = vector.shape_cast %55 : vector<1x8xf32> to vector<1x8x1xf32>
    %57 = tpu.reciprocal %56 {approx = true} : vector<1x8x1xf32> -> vector<1x8x1xf32>
    %58 = vector.broadcast %57 : vector<1x8x1xf32> to vector<1x8x12xf32>
    %59 = arith.mulf %54, %58 : vector<1x8x12xf32>
    "tpu.trace_start"() <{level = 10 : i32, message = "bqk,bkd->bqd"}> : () -> ()
    %cst_31 = arith.constant dense<0.000000e+00> : vector<1x8x8xf32>
    %60 = tpu.matmul %59, %45, %cst_31 {dimension_numbers = #tpu.dot_dimension_numbers<[2], [1], [1], [2], [0, 0, 0, 1, 1, 2], [0], [0]>} : vector<1x8x12xf32>, vector<1x12x8xf32>, vector<1x8x8xf32> -> vector<1x8x8xf32>
    "tpu.trace_stop"() : () -> ()
    %61 = tpu.concatenate %42, %60 in 1 : vector<1x8x8xf32>, vector<1x8x8xf32> -> vector<1x16x8xf32>
    %62 = vector.shape_cast %61 : vector<1x16x8xf32> to vector<16x8xf32>
    %c0_32 = arith.constant 0 : index
    %c0_33 = arith.constant 0 : index
    %c0_34 = arith.constant 0 : index
    %63 = vector.load %arg9[%c0_32, %c0_33, %c0_34] : memref<1x8x32xf32, #tpu.memory_space<vmem>>, vector<1x8x32xf32>
    %64 = vector.shape_cast %63 : vector<1x8x32xf32> to vector<8x32xf32>
    %cst_35 = arith.constant dense<0.000000e+00> : vector<16x32xf32>
    %65 = tpu.matmul %62, %64, %cst_35 {dimension_numbers = #tpu.dot_dimension_numbers<[1], [0], [0], [1], [0, 0, 1, 1], [], []>} : vector<16x8xf32>, vector<8x32xf32>, vector<16x32xf32> -> vector<16x32xf32>
    %c0_i32 = arith.constant 0 : i32
    %66 = arith.cmpi eq, %arg1, %c0_i32 : i32
    %67 = arith.extui %66 : i1 to i32
    %c0_i32_36 = arith.constant 0 : i32
    %68 = arith.cmpi ne, %67, %c0_i32_36 : i32
    scf.if %68 {
      %c0_40 = arith.constant 0 : index
      %c0_41 = arith.constant 0 : index
      %75 = vector.load %arg10[%c0_40, %c0_41] : memref<1x32xf32, #tpu.memory_space<vmem>>, vector<1x32xf32>
      %76 = vector.broadcast %75 : vector<1x32xf32> to vector<16x32xf32>
      %77 = arith.addf %65, %76 : vector<16x32xf32>
      %c0_42 = arith.constant 0 : index
      %c0_43 = arith.constant 0 : index
      %78 = vector.load %arg13[%c0_42, %c0_43] : memref<16x32xf32, #tpu.memory_space<vmem>>, vector<16x32xf32>
      tpu.vector_store %arg13[%c0_42, %c0_43], %77 {strides = array<i32>} : memref<16x32xf32, #tpu.memory_space<vmem>>, vector<16x32xf32>,
    } else {
    }
    %c0_i32_37 = arith.constant 0 : i32
    %69 = arith.cmpi ne, %arg1, %c0_i32_37 : i32
    %70 = arith.extui %69 : i1 to i32
    %c0_i32_38 = arith.constant 0 : i32
    %71 = arith.cmpi ne, %70, %c0_i32_38 : i32
    scf.if %71 {
      %c0_40 = arith.constant 0 : index
      %c0_41 = arith.constant 0 : index
      %75 = vector.load %arg13[%c0_40, %c0_41] : memref<16x32xf32, #tpu.memory_space<vmem>>, vector<16x32xf32>
      %76 = arith.addf %75, %65 : vector<16x32xf32>
      %c0_42 = arith.constant 0 : index
      %c0_43 = arith.constant 0 : index
      %77 = vector.load %arg13[%c0_42, %c0_43] : memref<16x32xf32, #tpu.memory_space<vmem>>, vector<16x32xf32>
      tpu.vector_store %arg13[%c0_42, %c0_43], %76 {strides = array<i32>} : memref<16x32xf32, #tpu.memory_space<vmem>>, vector<16x32xf32>,
    } else {
    }
    %c3_i32 = arith.constant 3 : i32
    %72 = arith.cmpi eq, %arg1, %c3_i32 : i32
    %73 = arith.extui %72 : i1 to i32
    %c0_i32_39 = arith.constant 0 : i32
    %74 = arith.cmpi ne, %73, %c0_i32_39 : i32
    scf.if %74 {
      %c0_40 = arith.constant 0 : index
      %c0_41 = arith.constant 0 : index
      %75 = vector.load %arg13[%c0_40, %c0_41] : memref<16x32xf32, #tpu.memory_space<vmem>>, vector<16x32xf32>
      %c0_42 = arith.constant 0 : index
      %c0_43 = arith.constant 0 : index
      %76 = vector.load %arg12[%c0_42, %c0_43] : memref<16x32xf32, #tpu.memory_space<vmem>>, vector<16x32xf32>
      tpu.vector_store %arg12[%c0_42, %c0_43], %75 {strides = array<i32>} : memref<16x32xf32, #tpu.memory_space<vmem>>, vector<16x32xf32>,
    } else {
    }
    return
  }
  func.func @transform_0(%arg0: i32, %arg1: i32) -> (i32, i32) {
    %c0_i32 = arith.constant 0 : i32
    %c0_i32_0 = arith.constant 0 : i32
    return %arg0, %c0_i32 : i32, i32
  }
  func.func @transform_1(%arg0: i32, %arg1: i32) -> (i32, i32, i32) {
    %c0_i32 = arith.constant 0 : i32
    %c0_i32_0 = arith.constant 0 : i32
    %c0_i32_1 = arith.constant 0 : i32
    return %arg1, %c0_i32, %c0_i32_0 : i32, i32, i32
  }
  func.func @transform_2(%arg0: i32, %arg1: i32) -> (i32, i32, i32) {
    %c0_i32 = arith.constant 0 : i32
    %c0_i32_0 = arith.constant 0 : i32
    %c0_i32_1 = arith.constant 0 : i32
    return %arg1, %c0_i32, %c0_i32_0 : i32, i32, i32
  }
  func.func @transform_3(%arg0: i32, %arg1: i32) -> (i32, i32, i32) {
    %c0_i32 = arith.constant 0 : i32
    %c0_i32_0 = arith.constant 0 : i32
    %c0_i32_1 = arith.constant 0 : i32
    return %arg1, %c0_i32, %c0_i32_0 : i32, i32, i32
  }
  func.func @transform_4(%arg0: i32, %arg1: i32) -> (i32, i32, i32) {
    %c0_i32 = arith.constant 0 : i32
    %c0_i32_0 = arith.constant 0 : i32
    %c0_i32_1 = arith.constant 0 : i32
    return %arg1, %c0_i32, %c0_i32_0 : i32, i32, i32
  }
  func.func @transform_5(%arg0: i32, %arg1: i32) -> (i32, i32, i32) {
    %c0_i32 = arith.constant 0 : i32
    %c0_i32_0 = arith.constant 0 : i32
    %c0_i32_1 = arith.constant 0 : i32
    return %arg1, %c0_i32, %c0_i32_0 : i32, i32, i32
  }
  func.func @transform_6(%arg0: i32, %arg1: i32) -> (i32, i32, i32) {
    %c0_i32 = arith.constant 0 : i32
    %c0_i32_0 = arith.constant 0 : i32
    %c0_i32_1 = arith.constant 0 : i32
    return %arg1, %c0_i32, %c0_i32_0 : i32, i32, i32
  }
  func.func @transform_7(%arg0: i32, %arg1: i32) -> (i32, i32, i32) {
    %c0_i32 = arith.constant 0 : i32
    %c0_i32_0 = arith.constant 0 : i32
    %c0_i32_1 = arith.constant 0 : i32
    return %arg1, %c0_i32, %c0_i32_0 : i32, i32, i32
  }
  func.func @transform_8(%arg0: i32, %arg1: i32) -> (i32, i32) {
    %c0_i32 = arith.constant 0 : i32
    %c0_i32_0 = arith.constant 0 : i32
    %c0_i32_1 = arith.constant 0 : i32
    return %c0_i32, %c0_i32_0 : i32, i32
  }
  func.func @transform_9(%arg0: i32, %arg1: i32) -> (i32, i32) {
    %c0_i32 = arith.constant 0 : i32
    %c0_i32_0 = arith.constant 0 : i32
    %c0_i32_1 = arith.constant 0 : i32
    return %c0_i32, %c0_i32_0 : i32, i32
  }
  func.func @transform_10(%arg0: i32, %arg1: i32) -> (i32, i32) {
    %c0_i32 = arith.constant 0 : i32
    %c0_i32_0 = arith.constant 0 : i32
    return %arg0, %c0_i32 : i32, i32
  }
}

</mosaic_0001>

<bundles_post_ra>
// kernel: tpu_custom_call.1
= control target key start
LH: loop header
LB: loop body
LE: loop exit
PB: predicated region body
PF: predicated region fallthrough
CT: control target
= control target key end

     0   :  { %s1996_s0 = inlined_call_operand.vmem [shape: f32[32,32], index: 0, kind: input, shape index: {}]   ;;  %s1997_s1 = inlined_call_operand.vmem [shape: f32[4,32,8], index: 1, kind: input, shape index: {}]   ;;  %s1998_s2 = inlined_call_operand.vmem [shape: f32[4,1,8], index: 2, kind: input, shape index: {}]   ;;  %s1999_s3 = inlined_call_operand.vmem [shape: f32[4,32,8], index: 3, kind: input, shape index: {}]   ;;  %s2000_s4 = inlined_call_operand.vmem [shape: f32[4,1,8], index: 4, kind: input, shape index: {}]   ;;  %s2001_s5 = inlined_call_operand.vmem [shape: f32[4,32,8], index: 5, kind: input, shape index: {}]   ;;  %s2002_s6 = inlined_call_operand.vmem [shape: f32[4,1,8], index: 6, kind: input, shape index: {}]   ;;  %s2003_s7 = inlined_call_operand.vmem [shape: f32[4,8,32], index: 7, kind: input, shape index: {}]   ;;  %s2004_s8 = inlined_call_operand.vmem [shape: f32[1,32], index: 8, kind: input, shape index: {}]   ;;  %s2005_s9 = inlined_call_operand.vmem [shape: f32[16,12], index: 9, kind: input, shape index: {}]   ;;  %s2006_s10 = inlined_call_operand.hbm [shape: f32[32,32], index: 10, kind: output, shape index: {}]  }
   0x1   :  { %2011 = sst [smem:[#allocation10_spill]] %s1999_s3 }
   0x2   :  { %15 = vsyncpa [#allocation4], 0 }
   0x3   :  { %17 = vsyncpa [#allocation4 + $0x1], 0  ;;  %s1763_s13 = smov 0   ;;  %s1765_s14 = smov 0  }
   0x4   :  { %s1767_s15 = smov 0   ;;  %s1769_s16 = smov 0  }
   0x5   :  { %s1771_s17 = smov 0   ;;  %s1773_s18 = smov 0  }
   0x6   :  { %s1775_s19 = smov 0   ;;  %s1777_s20 = smov 0  }
   0x7 LB: > { %2012 = sst [smem:[#allocation6_spill]] %s1693_s18  ;;  %s1378_s21 = sadd.s32 4294967295, %s1701_s20   ;;  %s1701_s20 = sphi %s1777_s20, %s23_s20   ;;  %s1697_s19 = sphi %s1775_s19, %s2023_s19   ;;  %s1693_s18 = sphi %s1773_s18, %s2022_s18   ;;  %s1689_s17 = sphi %s1771_s17, %s2021_s17   ;;  %s1685_s16 = sphi %s1769_s16, %s2020_s16   ;;  %s1681_s15 = sphi %s1767_s15, %s2026_s15   ;;  %s1677_s14 = sphi %s1765_s14, %s2025_s14   ;;  %s1673_s13 = sphi %s1763_s13, %s2024_s13  }
   0x8   : > { %2013 = sst [smem:[#allocation7_spill]] %s1697_s19  ;;  %s1379_s22 = sadd.s32 4294967294, %s1701_s20  }
   0x9   : > { %s32_s23 = sadd.s32 1, %s1693_s18  ;;  %s35_s24 = sadd.s32 1, %s1697_s19 }
   0xa   : > { %p33_p0 = scmp.ge.s32.totalorder %s32_s23, 4  ;;  %p302_p1 = scmp.ne.s32.totalorder %s1681_s15, %s1677_s14 }
   0xb   : > { %p303_p2 = scmp.eq.s32.totalorder %s1378_s21, 7  ;;  %p308_p4 = scmp.ne.s32.totalorder %s1677_s14, %s1673_s13 }
   0xc   : > { %s2028_s23 = smov (%p33_p0, %s32_s23), 0  ;;  %s2030_s24 = smov (!%p33_p0, %s35_s24), %s1697_s19 }
   0xd   : > { %2014 = sst [smem:[#allocation8_spill]] %s2028_s23  ;;  %p1812_p3 = por %p303_p2, %p302_p1 }
   0xe   : > { %p37_p5 = scmp.ge.s32.totalorder %s2030_s24, 2  ;;  %p309_p6 = scmp.eq.s32.totalorder %s1379_s22, 7 }
   0xf   : > { %p1382_p7 = scmp.ge.s32.totalorder %s1701_s20, 1  ;;  %p391_p8 = scmp.lt.s32.totalorder %s1701_s20, 9 }
  0x10   : > { %s2032_s24 = smov (%p37_p5, %s2030_s24), 0  ;;  %p1822_p9 = por %p309_p6, %p308_p4 }
  0x11   : > { %2016 = sst [smem:[#allocation9_spill]] %s2032_s24  ;;  %p392_p10 = pnand %p1382_p7, %p391_p8 }
  0x12   : > { %s289_s27 = ssub.s32 %s1697_s19, %s2032_s24  ;;  %s292_s28 = sadd.s32 1, %s1681_s15 }
  0x13   : > { %p290_p11 = scmp.eq.s32.totalorder %s289_s27, 0  ;;  %395 = sbr.rel (%p392_p10) target bundleno = 1193 (0x4a9), region = 60 }
  0x14   : > { %p463_p12 = scmp.lt.s32.totalorder (!%p392_p10), %s1685_s16, 3  ;;  %s2010_s30 = sand.u32 (!%p392_p10), 1, %s1677_s14  }
  0x15   : > { %s1830_s29 = scalar_select %p290_p11, %s1681_s15, %s292_s28  }
  0x16   : > { %s1836_s11 = sshll.u32 (!%p392_p10), %s2010_s30, 4  ;;  %s1384_s12 = sshll.u32 (!%p392_p10), %s1689_s17, 1 }
  0x17   : > { %p458_p13 = scmp.lt.s32.totalorder (!%p392_p10), %s1384_s12, 3  ;;  %s2018_s3 = sld [smem:[#allocation10_spill]] (!%p392_p10) }
  0x18   : > { %s1840_s21 = scalar_select %p463_p12, %s1685_s16, 3  ;;  %vm505_vm0 = vcmask 261120   ;;  %v1703_v10 = vmov 0.0   ;;  %vm1704_vm1 = vmmov 0   ;;  %vm760_vm2 = vcmask 64512   ;;  %v759_v28 = vld [vmem:[%s2005_s9] sm:$0xff] }
  0x19   : > { %s2034_s12 = smov (!%p458_p13, %s1384_s12), 3  ;;  %vm855_vm3 = vcmask 1043456   ;;  %vm840_vm4 = vcmask 97280   ;;  %v929_v33 = vld [vmem:[%s2005_s9 + $0x8] sm:$0xff]  ;;  %p1414_p0 = scmp.ne.s32.totalorder %s1685_s16, 0 }
  0x1a   : > { %s1843_s22 = sshll.u32 %s1840_s21, 5  ;;  %s1385_s30 = sshll.u32 %s2034_s12, 3 }
  0x1b   : > { %s467_s18 = scalar_lea.vmem %s1997_s1, %s1843_s22  ;;  %s478_s19 = scalar_lea.vmem %s2000_s4, %s1840_s21 }
  0x1c   : > { %v497_v2 = vld [vmem:[%s467_s18 + $0x18] sm:$0xff]  ;;  %v496_v3 = vld [vmem:[%s467_s18 + $0x10] sm:$0xff]  ;;  %v495_v5 = vld [vmem:[%s467_s18 + $0x8] sm:$0xff]  ;;  %s483_s28 = scalar_lea.vmem %s2001_s5, %s1843_s22  ;;  %s1392_s12 = sshll.u32 %s1840_s21, 3 }
  0x1d   : > { %s475_s24 = scalar_lea.vmem %s2018_s3, %s1843_s22  ;;  %1460 = vmatprep.subr.mxu0 %v497_v2  ;;  %s461_s3 = scalar_lea.vmem %s1996_s0, %s1385_s30  ;;  %v494_v8 = vld [vmem:[%s467_s18] sm:$0xff]  ;;  %v676_v24 = vld [vmem:[%s483_s28 + $0x18] sm:$0xff]  ;;  %v675_v25 = vld [vmem:[%s483_s28 + $0x10] sm:$0xff] }
  0x1e   : > { %v590_v0 = vld [vmem:[%s475_s24 + $0x18] sm:$0xff]  ;;  %v589_v1 = vld [vmem:[%s475_s24 + $0x10] sm:$0xff]  ;;  %v588_v4 = vld [vmem:[%s475_s24 + $0x8] sm:$0xff]  ;;  %1461 = vmatpush3.msra.mxu0 %v497_v2  ;;  %s470_s30 = scalar_lea.vmem %s1998_s2, %s1840_s21  ;;  %s490_s22 = scalar_lea.vmem %s2003_s7, %s1392_s12 }
  0x1f   : > { %1471 = vmatprep.subr.mxu1 %v590_v0  ;;  %1462 = vmatprep.subr.mxu0 %v496_v3  ;;  %v587_v6 = vld [vmem:[%s475_s24] sm:$0xff]  ;;  %v493_v9 = vld [vmem:[%s461_s3 + $0x8] sm:$0xff] }
  0x20   : > { %1472 = vmatpush3.msra.mxu1 %v590_v0  ;;  %1463 = vmatpush3.msra.mxu0 %v496_v3  ;;  %v492_v7 = vld [vmem:[%s461_s3] sm:$0xff]  ;;  %v674_v26 = vld [vmem:[%s483_s28 + $0x8] sm:$0xff]  ;;  %s456_s3 = scalar_lea.vmem [#allocation3], %s1836_s11 }
  0x21   : > { %1473 = vmatprep.subr.mxu1 %v589_v1  ;;  %1479 = vmatprep.mubr.msk.f32.mxu1 %vm505_vm0, %v492_v7  ;;  %v1396_v11 = vld [vmem:[%s478_s19] ss:$0 sm:$0xff] }
  0x22   : > { %1474 = vmatpush3.msra.mxu1 %v589_v1  ;;  %1464 = vmatprep.subr.mxu0 %v495_v5  ;;  %v1393_v16 = vld [vmem:[%s470_s30] ss:$0 sm:$0xff]  ;;  %s486_s30 = scalar_lea.vmem %s2002_s6, %s1840_s21 }
  0x23   : > { %1475 = vmatprep.subr.mxu1 %v588_v4  ;;  %1465 = vmatpush3.msra.mxu0 %v495_v5  ;;  %v673_v27 = vld [vmem:[%s483_s28] sm:$0xff] }
  0x24   : > { %1476 = vmatpush3.msra.mxu1 %v588_v4  ;;  %1466 = vmatprep.subr.mxu0 %v494_v8  ;;  %v1399_v49 = vld [vmem:[%s486_s30] ss:$0 sm:$0xff] }
  0x25   : > { %1477 = vmatprep.subr.mxu1 %v587_v6  ;;  %1467 = vmatpush3.msra.mxu0 %v494_v8  ;;  %v1101_v62 = vld [vmem:[%s490_s22] sm:$0xff] }
  0x26   : > { %1478 = vmatpush3.msra.mxu1 %v587_v6  ;;  %1468 = vmatprep.mubr.msk.f32.mxu0 %vm505_vm0, %v492_v7 }
  0x27   : > { %1480 = vmatmul.mubr.msk.f32.vlgmr.msra.gmra.mxu1 %vm505_vm0, %v493_v9  ;;  %1469 = vmatmul.mubr.msk.f32.vlgmr.msra.gmra.mxu0 %vm505_vm0, %v493_v9 }
  0x28   : > { %1490 = vmatprep.mubr.msk.f32.mxu0 %vm505_vm0, %v492_v7  ;;  %1493 = vmatprep.subr.mxu1 %v1703_v10 }
  0x29   : > { %1497 = vmatprep.mubr.msk.f32.mxu1 %vm1704_vm1, %v1703_v10  ;;  %1482 = vmatprep.subr.mxu0 %v676_v24 }
  0x2a   : > { %1483 = vmatpush3.msra.mxu0 %v676_v24 }
  0x2b   : > { %1484 = vmatprep.subr.mxu0 %v675_v25 }
  0x2c   : > { %1485 = vmatpush3.msra.mxu0 %v675_v25 }
  0x2d   : > { %1486 = vmatprep.subr.mxu0 %v674_v26 }
  0x2e   : > { %1487 = vmatpush3.msra.mxu0 %v674_v26 }
  0x2f   : > { %1488 = vmatprep.subr.mxu0 %v673_v27 }
  0x30   : > { %1489 = vmatpush3.msra.mxu0 %v673_v27 }
  0x31   : > { %1491 = vmatmul.mubr.msk.f32.vlgmr.msra.gmra.mxu0 %vm505_vm0, %v493_v9  ;;  %1500 = vmatprep.subr.mxu0 %v1703_v10 }
  0x32   : > { %1504 = vmatprep.mubr.msk.f32.mxu0 %vm1704_vm1, %v1703_v10 }
  0xe7   : > { %v1481_v12 = vpop.f32.mrf.mxu1  ;;  %v1470_v15 = vpop.f32.mrf.mxu0 }
  0xe8   : > { %v670_v13 = vadd.f32 %v1481_v12, %v1396_v11  ;;  %v584_v23 = vadd.f32 %v1470_v15, %v1393_v16 }
  0xe9   : > { %v664_v14 = vpop.f32.mrf.mxu1  ;;  %v578_v17 = vpop.f32.mrf.mxu0 }
  0xea   : > { %1494 = vmatpush3.xpose.msk.msra.mxu1 %vm760_vm2, %v670_v13  ;;  %v665_v18 = vadd.f32 %v1396_v11, %v664_v14  ;;  %v579_v19 = vadd.f32 %v1393_v16, %v578_v17  ;;  %v931_v20 = vrot.slane %v670_v13, 4 }
  0xeb   : > { %1495 = vmatprep.subr.mxu1 %v1703_v10 }
  0xec   : > { %v930_v21 = vrot.slane %v665_v18, 4 }
  0xee   : > { %1496 = vmatpush3.xpose.msk.msra.mxu1 %vm760_vm2, %v665_v18  ;;  %v932_v22 = vsel %vm855_vm3, %v930_v21, %v931_v20 }
  0xef   : > { %1507 = vmatprep.subr.mxu1 %v1703_v10 }
  0xf1   : > { %1498 = vmatmul.mubr.msk.f32.vlgmr.msra.gmra.mxu1 %vm760_vm2, %v579_v19  ;;  %v1492_v48 = vpop.f32.mrf.mxu0 }
  0xf2   : > { %1508 = vmatpush3.xpose.msk.msra.mxu1 %vm760_vm2, %v931_v20  ;;  %1511 = vmatprep.mubr.msk.f32.mxu1 %vm1704_vm1, %v1703_v10  ;;  %v756_v50 = vadd.f32 %v1492_v48, %v1399_v49 }
  0xf3   : > { %1509 = vmatprep.subr.mxu1 %v1703_v10  ;;  %v750_v51 = vpop.f32.mrf.mxu0 }
  0xf4   : > { %v751_v52 = vadd.f32 %v1399_v49, %v750_v51  ;;  %1501 = vmatpush3.msk.msra.mxu0 %vm855_vm3, %v756_v50  ;;  %v1023_v53 = vrot.slane %v756_v50, 4 }
  0xf5   : > { %1502 = vmatprep.subr.mxu0 %v1703_v10 }
  0xf6   : > { %1510 = vmatpush3.xpose.msk.msra.mxu1 %vm760_vm2, %v932_v22  ;;  %v1022_v54 = vrot.slane %v751_v52, 4  ;;  %1503 = vmatpush3.msra.mxu0 %v751_v52 }
  0xf7   : > { %1514 = vmatprep.subr.mxu0 %v1703_v10 }
  0xf8   : > { %v1024_v55 = vsel %vm855_vm3, %v1022_v54, %v1023_v53 }
  0xf9   : > { %1512 = vmatmul.mubr.msk.f32.vlgmr.msra.gmra.mxu1 %vm760_vm2, %v584_v23 }
 0x1b1   : > { %v836_v29 = vpop.f32.mrf.mxu1 }
 0x1b2   : > { %v837_v30 = vadd.f32 %v836_v29, %v759_v28 }
 0x1b3   : > { %v1499_v31 = vpop.f32.mrf.mxu1 }
 0x1b4   : > { %v841_v32 = vsel %vm840_vm4, %v837_v30, -inf }
 0x1b5   : > { %842 = vmax.xlane.f32.xlu0 %v841_v32 }
 0x1b9   : > { %v1006_v34 = vpop.f32.mrf.mxu1 }
 0x1ba   : > { %v1007_v35 = vadd.f32 %v1006_v34, %v929_v33 }
 0x1bb   : > { %v1513_v36 = vpop.f32.mrf.mxu1 }
 0x1bc   : > { %v1010_v37 = vsel %vm840_vm4, %v1007_v35, -inf }
 0x1bd   : > { %1011 = vmax.xlane.f32.xlu0 %v1010_v37 }
 0x23e   : > { %v843_v38 = vpop.xlane.xlu0 %842 }
 0x23f   : > { %v844_v39 = vsub.f32 %v837_v30, %v843_v38 }
 0x241   : > { %v845_v40 = vmul.f32 1.442695, %v844_v39 }
 0x243   : > { %1601 = vpow2.f32 %v845_v40 }
 0x246   : > { %v1012_v41 = vpop.xlane.xlu0 %1011 }
 0x247   : > { %v1013_v42 = vsub.f32 %v1007_v35, %v1012_v41 }
 0x249   : > { %v1014_v43 = vmul.f32 1.442695, %v1013_v42 }
 0x24b   : > { %1603 = vpow2.f32 %v1014_v43 }
 0x250   : > { %v1602_v44 = vpop.eup %1601 }
 0x251   : > { %v847_v45 = vsel %vm840_vm4, %v1602_v44, 0.0 }
 0x252   : > { %848 = vadd.xlane.f32.xlu1 %v847_v45 }
 0x258   : > { %v1604_v46 = vpop.eup %1603 }
 0x259   : > { %v1016_v47 = vsel %vm840_vm4, %v1604_v46, 0.0 }
 0x25a   : > { %1017 = vadd.xlane.f32.xlu1 %v1016_v47 }
 0x2db   : > { %v849_v56 = vpop.xlane.xlu1 %848 }
 0x2dc   : > { %1605 = vrcp.f32 %v849_v56 }
 0x2e3   : > { %v1018_v57 = vpop.xlane.xlu1 %1017 }
 0x2e4   : > { %1607 = vrcp.f32 %v1018_v57 }
 0x2e9   : > { %v1606_v58 = vpop.eup %1605 }
 0x2ea   : > { %v851_v59 = vmul.f32 %v1606_v58, %v1602_v44 }
 0x2ec   : > { %1505 = vmatmul.mubr.msk.f32.vlgmr.msra.gmra.mxu0 %vm840_vm4, %v851_v59 }
 0x2ed   : > { %1515 = vmatpush3.msk.msra.mxu0 %vm855_vm3, %v1023_v53  ;;  %1518 = vmatprep.mubr.msk.f32.mxu0 %vm1704_vm1, %v1703_v10 }
 0x2ee   : > { %1516 = vmatprep.subr.mxu0 %v1703_v10 }
 0x2ef   : > { %1517 = vmatpush3.msra.mxu0 %v1024_v55 }
 0x2f0   : > { %1521 = vmatprep.subr.mxu0 %v1101_v62 }
 0x2f1   : > { %v1608_v60 = vpop.eup %1607 }
 0x2f2   : > { %v1020_v61 = vmul.f32 %v1608_v60, %v1604_v46 }
 0x2f4   : > { %1519 = vmatmul.mubr.msk.f32.vlgmr.msra.gmra.mxu0 %vm840_vm4, %v1020_v61 }
 0x2f5   : > { %1522 = vmatpush3.msra.mxu0 %v1101_v62 }
 0x3ac   : > { %v925_v63 = vpop.f32.mrf.mxu0 }
 0x3ad   : > { %1523 = vmatprep.mubr.msk.f32.mxu0 %vm760_vm2, %v925_v63 }
 0x3ae   : > { %v1506_v0 = vpop.f32.mrf.mxu0 }
 0x3b4   : > { %v1097_v1 = vpop.f32.mrf.mxu0 }
 0x3b5   : > { %1524 = vmatmul.mubr.msk.f32.vlgmr.msra.gmra.mxu0 %vm760_vm2, %v1097_v1 }
 0x3b6   : > { %v1520_v2 = vpop.f32.mrf.mxu0 }
 0x473   : > { %1186 = sbr.rel (%p1414_p0) target bundleno = 1148 (0x47c), region = 64 }
 0x475   : > { %v1525_v3 = vpop.f32.mrf.mxu0 }
 0x477   : > { %v1174_v4 = vpop.f32.mrf.mxu0 }
 0x478   : > { %v1415_v5 = vld [vmem:[%s2004_s8] ss:$0 sm:$0xff] }
 0x479   : > { %v1194_v6 = vadd.f32 %v1415_v5, %v1174_v4  ;;  %v1195_v7 = vadd.f32 %v1525_v3, %v1415_v5 }
 0x47b   : > { %1196 = vst.msk [vmem:[#allocation2] sm:$0xff] %vm505_vm0, %v1194_v6  ;;  %1197 = vst.msk [vmem:[#allocation2 + $0x8] sm:$0xff] %vm505_vm0, %v1195_v7 }
 0x47c PF: > { %p1416_p1 = scmp.eq.s32.totalorder %s1685_s16, 0 }
 0x47e   : > { %1201 = sbr.rel (%p1416_p1) target bundleno = 1159 (0x487), region = 68 }
 0x483   : > { %v1202_v8 = vld [vmem:[#allocation2] sm:$0xff]  ;;  %v1203_v9 = vld [vmem:[#allocation2 + $0x8] sm:$0xff] }
 0x484   : > { %v1204_v10 = vadd.f32 %v1202_v8, %v1174_v4  ;;  %v1205_v11 = vadd.f32 %v1525_v3, %v1203_v9 }
 0x486   : > { %1206 = vst.msk [vmem:[#allocation2] sm:$0xff] %vm505_vm0, %v1204_v10  ;;  %1207 = vst.msk [vmem:[#allocation2 + $0x8] sm:$0xff] %vm505_vm0, %v1205_v11 }
 0x487 PF: > { %p1417_p2 = scmp.ne.s32.totalorder %s1685_s16, 3 }
 0x489   : > { %1211 = sbr.rel (%p1417_p2) target bundleno = 1168 (0x490), region = 72 }
 0x48e   : > { %v1212_v12 = vld [vmem:[#allocation2] sm:$0xff]  ;;  %v1213_v13 = vld [vmem:[#allocation2 + $0x8] sm:$0xff] }
 0x48f   : > { %1214 = vst.msk [vmem:[%s456_s3] sm:$0xff] %vm505_vm0, %v1212_v12  ;;  %1215 = vst.msk [vmem:[%s456_s3 + $0x8] sm:$0xff] %vm505_vm0, %v1213_v13 }
 0x490 PF: > { %s1426_s11 = sshll.u32 %s1689_s17, 8  ;;  %s1230_s30 = sshll.u32 %s456_s3, 4  ;;  %s1941_s30 = int_to_ptr.vmem [resolvable:$true] %s1230_s30 }
 0x491   : > { %s1939_s24 = scalar_lea.hbm %s2006_s10, %s1426_s11  ;;  %s2019_s16 = sand.u32 1, %s1677_s14  }
 0x492   : > { %s1945_s12 = scalar_lea.sflag [#allocation4], %s2019_s16  ;;  %s1609_s27 = scalar_lea.vmem %s1941_s30, 256 }
 0x493   : > { %p1610_p4 = scmp.ne.s32.totalorder %s1941_s30, %s1609_s27  ;;  %s1705_s17 = smov [#allocation3]  }
 0x494   : > { %s1613_s28 = sshll.u32 %s1705_s17, 4  ;;  %s1614_s28 = int_to_ptr.vmem [resolvable:$false] %s1613_s28 }
 0x495   : > { %p1611_p5 = pnand %p1610_p4, %p1812_p3  ;;  %s1615_s22 = scalar_lea.vmem %s1614_s28, 512 }
 0x496   : > { %p1616_p7 = scmp.lt.s32.totalorder %s1941_s30, %s1614_s28  ;;  %p1617_p8 = scmp.lt.s32.totalorder %s1615_s22, %s1609_s27 }
 0x497   : > { %p1612_p6 = pneg %p1611_p5 }
 0x498   : > { %p1618_p10 = por %p1617_p8, %p1616_p7 }
 0x49a   : > { %p1619_p11 = pnand %p1618_p10, %p1612_p6 }
 0x49c   : > { %1622 = shalt.err (!%p1619_p11)
}
 0x49d   : > { %s1623_s3 = scalar_lea.hbm %s1939_s24, 256  ;;  %s1627_s11 = scalar_lea.hbm %s2006_s10, 512 }
 0x49e   : > { %p1624_p12 = scmp.ne.s32.totalorder %s1939_s24, %s1623_s3  ;;  %p1628_p1 = scmp.lt.s32.totalorder %s1939_s24, %s2006_s10 }
 0x49f   : > { %p1629_p2 = scmp.lt.s32.totalorder %s1627_s11, %s1623_s3 }
 0x4a0   : > { %p1625_p13 = pnand %p1624_p12, %p1812_p3 }
 0x4a1   : > { %p1630_p4 = por %p1629_p2, %p1628_p1 }
 0x4a2   : > { %p1626_p0 = pneg %p1625_p13 }
 0x4a4   : > { %p1631_p5 = pnand %p1630_p4, %p1626_p0 }
 0x4a6   : > { %1634 = shalt.err (!%p1631_p5)
}
 0x4a7   : > { %s1706_s16 = smov 128   ;;  %s1707_s27 = smov 8  }
 0x4a8   : > { %1526 = dma.vmem_to_hbm [thread:$0]  (%p1812_p3), %s1941_s30, 256, %s1939_s24, %s1945_s12, %s1706_s16, %s1706_s16, %s1707_s27  }
 0x4a9 PF: > { %p1532_p6 = scmp.ge.s32.totalorder %s1701_s20, 2  ;;  %s1245_s17 = sand.u32 1, %s1673_s13  }
 0x4aa   : > { %s1246_s28 = scalar_lea.sflag [#allocation4], %s1245_s17 }
 0x4ab   : > { %p1529_p7 = pnand %p1532_p6, %p1822_p9 }
 0x4ad   : > { %p1530_p8 = pneg %p1529_p7 }
 0x4af   : > { %1668 = dma.done.wait (%p1530_p8), %s1246_s28, 256  }
 0x4b0   : > { %1670 = vsyncadd (%p1530_p8), %s1246_s28, 4294967040  ;;  %s23_s20 = sadd.s32 1, %s1701_s20   ;;  %s2020_s16 = sld [smem:[#allocation6_spill]] }
 0x4b1   : > { %p20_p10 = scmp.ge.s32.totalorder %s23_s20, 10   ;;  %s2021_s17 = sld [smem:[#allocation7_spill]] }
 0x4b2   : > { %s2022_s18 = sld [smem:[#allocation8_spill]]  ;;  %s2024_s13 = smov %s1677_s14 }
 0x4b3   : > { %s2023_s19 = sld [smem:[#allocation9_spill]]  ;;  %s2025_s14 = smov %s1681_s15 }
 0x4b4   : > { %s2026_s15 = smov %s1830_s29  ;;  %22 = sbr.rel (!%p20_p10) target bundleno = 7 (0x7), region = 128 }
 0x4b9   :  { %1251 = vsyncpa [#allocation4], 1 }
 0x4ba   :  { %1253 = vsyncpa [#allocation4 + $0x1], 1 }

</bundles_post_ra>
